<compile_context>
chip_gen: v7x
topology: tpu7x:2x2x1
jax: 0.10.0
libtpu: 0.0.40
codegen_flags: <defaults>
</compile_context>

<pallas_src>
import jax
import jax.numpy as jnp
from jax.experimental import pallas as pl
from jax.experimental.pallas import tpu as pltpu

LANE = 128
SLAB_COLS = 8  # [w1, b1, b2, w3, b3(row 0), pad, pad, pad]


def mlp_kernel(x_ref, slab_ref, w2_ref, o_ref):
    x = x_ref[...]                       # (1, Npad), batch on lanes
    slab = slab_ref[...]                 # (H, SLAB_COLS)

    w1 = slab[:, 0:1]                    # (H1, 1)
    b1 = slab[:, 1:2]                    # (H1, 1)
    b2 = slab[:, 2:3]                    # (H2, 1)
    w3 = slab[:, 3:4]                    # (H2, 1)
    b3 = slab[0:1, 4:5]                  # (1, 1)

    # hidden: Linear(F=1 -> H1) + sigmoid.  K=1 -> outer product on VPU/EUP.
    h1 = jax.nn.sigmoid(w1 * x + b1)                              # (H1, Npad)

    # hidden2: Linear(H1 -> H2) + relu.  Real matmul on the MXU.
    h2 = jnp.dot(w2_ref[...], h1, preferred_element_type=jnp.float32) + b2
    h2 = jnp.maximum(h2, 0.0)                                     # (H2, Npad)

    # predict: Linear(H2 -> 1).  VPU multiply + XLU sublane reduce.
    out = jnp.sum(w3 * h2, axis=0, keepdims=True) + b3            # (1, Npad)
    o_ref[...] = out.astype(o_ref.dtype)


def pack_params(p):
    """Pack the narrow params (PyTorch layout) into the kernel's (H, 8) slab.
    Done ONCE at init time, not per forward call."""
    h1 = p["w1"].shape[0]
    h2 = p["w2"].shape[0]
    assert h1 == h2, "slab packing assumes n_hidden == n_hidden2"
    assert p["w3"].shape[0] == 1, "kernel final layer assumes n_output == 1"
    slab = jnp.zeros((h1, SLAB_COLS), jnp.float32)
    slab = slab.at[:, 0].set(p["w1"][:, 0])     # hidden.weight  (H1, 1) -> col 0
    slab = slab.at[:, 1].set(p["b1"])           # hidden.bias    (H1,)   -> col 1
    slab = slab.at[:, 2].set(p["b2"])           # hidden2.bias   (H2,)   -> col 2
    slab = slab.at[:, 3].set(p["w3"][0, :])     # predict.weight (1, H2) -> col 3
    slab = slab.at[0, 4].set(p["b3"][0])        # predict.bias   scalar  -> (0, 4)
    return slab, p["w2"]


def net_forward(x, slab, w2):
    """x: (N, 1) f32; slab: (H, 8) packed params; w2: (H2, H1). Returns (N, 1)."""
    N, F = x.shape
    assert F == 1, "Net spec has n_features == 1"

    n_pad = pl.cdiv(N, LANE) * LANE
    # (N,1) -> (1,N) is a pure reshape (no transpose), then one pad to lanes.
    x_t = jnp.pad(x.reshape(1, N), ((0, 0), (0, n_pad - N)))

    vmem = pl.BlockSpec(memory_space=pltpu.MemorySpace.VMEM)

    out_t = pl.pallas_call(
        mlp_kernel,
        out_shape=jax.ShapeDtypeStruct((1, n_pad), jnp.float32),
        in_specs=[vmem, vmem, vmem],
        out_specs=vmem,
    )(x_t, slab, w2)

    return out_t[:, :N].reshape(N, 1)


def init_params(key, n_features, n_hidden, n_hidden2, n_output):
    """PyTorch-layout params: weights ~ N(0,1) (per Net.init), biases keep the
    default nn.Linear init U(-1/sqrt(fan_in), 1/sqrt(fan_in))."""
    ks = jax.random.split(key, 6)

    def bias(k, fan_in, out):
        bound = 1.0 / jnp.sqrt(float(fan_in))
        return jax.random.uniform(k, (out,), jnp.float32, -bound, bound)

    return {
        "w1": jax.random.normal(ks[0], (n_hidden, n_features), jnp.float32),
        "b1": bias(ks[1], n_features, n_hidden),
        "w2": jax.random.normal(ks[2], (n_hidden2, n_hidden), jnp.float32),
        "b2": bias(ks[3], n_hidden, n_hidden2),
        "w3": jax.random.normal(ks[4], (n_output, n_hidden2), jnp.float32),
        "b3": bias(ks[5], n_hidden2, n_output),
    }


def reference_forward(x, p):
    """Plain-JAX reference in the standard PyTorch (N, F) layout."""
    h1 = jax.nn.sigmoid(x @ p["w1"].T + p["b1"])            # (N, H1)
    h2 = jnp.maximum(h1 @ p["w2"].T + p["b2"], 0.0)         # (N, H2)
    return h2 @ p["w3"].T + p["b3"]                         # (N, O)


if __name__ == "__main__":
    # Shapes implied by the module: x = linspace(-1, 1, 200)[:, None] -> (200, 1).
    N, n_features, n_hidden, n_hidden2, n_output = 200, 1, 32, 32, 1

    key = jax.random.PRNGKey(0)
    params = init_params(key, n_features, n_hidden, n_hidden2, n_output)
    slab, w2 = pack_params(params)           # one-time packing (3 DMAs per call)

    x = jnp.expand_dims(jnp.linspace(-1.0, 1.0, N, dtype=jnp.float32), axis=1)

    fwd = jax.jit(net_forward)
    out = jax.block_until_ready(fwd(x, slab, w2))

    ref = reference_forward(x, params)
    assert out.shape == (N, n_output)
    assert jnp.allclose(out, ref, atol=1e-4, rtol=1e-4)

    print("KERNEL_OK")
</pallas_src>

<mosaic_0001>
module attributes {stable_mosaic.version = 11 : i64} {
  func.func @mlp_kernel(%arg0: memref<1x256xf32, #tpu.memory_space<vmem>>, %arg1: memref<32x8xf32, #tpu.memory_space<vmem>>, %arg2: memref<32x32xf32, #tpu.memory_space<vmem>>, %arg3: memref<1x256xf32, #tpu.memory_space<vmem>>) attributes {dimension_semantics = [], scalar_prefetch = 0 : i64, scratch_operands = 0 : i64, tpu.core_type = #tpu.core_type<tc>} {
    %c0 = arith.constant 0 : index
    %c0_0 = arith.constant 0 : index
    %0 = vector.load %arg0[%c0, %c0_0] : memref<1x256xf32, #tpu.memory_space<vmem>>, vector<1x256xf32>
    %c0_1 = arith.constant 0 : index
    %c0_2 = arith.constant 0 : index
    %1 = vector.load %arg1[%c0_1, %c0_2] : memref<32x8xf32, #tpu.memory_space<vmem>>, vector<32x8xf32>
    %2 = vector.extract_strided_slice %1 {offsets = [0, 0], sizes = [32, 1], strides = [1, 1]} : vector<32x8xf32> to vector<32x1xf32>
    %3 = vector.extract_strided_slice %1 {offsets = [0, 1], sizes = [32, 1], strides = [1, 1]} : vector<32x8xf32> to vector<32x1xf32>
    %4 = vector.extract_strided_slice %1 {offsets = [0, 2], sizes = [32, 1], strides = [1, 1]} : vector<32x8xf32> to vector<32x1xf32>
    %5 = vector.extract_strided_slice %1 {offsets = [0, 3], sizes = [32, 1], strides = [1, 1]} : vector<32x8xf32> to vector<32x1xf32>
    %6 = vector.extract_strided_slice %1 {offsets = [0, 4], sizes = [1, 1], strides = [1, 1]} : vector<32x8xf32> to vector<1x1xf32>
    %7 = vector.broadcast %2 : vector<32x1xf32> to vector<32x256xf32>
    %8 = vector.broadcast %0 : vector<1x256xf32> to vector<32x256xf32>
    %9 = arith.mulf %7, %8 : vector<32x256xf32>
    %10 = vector.broadcast %3 : vector<32x1xf32> to vector<32x256xf32>
    %11 = arith.addf %9, %10 : vector<32x256xf32>
    %12 = arith.negf %11 : vector<32x256xf32>
    %13 = math.exp %12 : vector<32x256xf32>
    %cst = arith.constant 1.000000e+00 : f32
    %14 = vector.broadcast %cst : f32 to vector<32x256xf32>
    %15 = arith.addf %14, %13 : vector<32x256xf32>
    %16 = arith.divf %14, %15 : vector<32x256xf32>
    %c0_3 = arith.constant 0 : index
    %c0_4 = arith.constant 0 : index
    %17 = vector.load %arg2[%c0_3, %c0_4] : memref<32x32xf32, #tpu.memory_space<vmem>>, vector<32x32xf32>
    %cst_5 = arith.constant dense<0.000000e+00> : vector<32x256xf32>
    %18 = tpu.matmul %17, %16, %cst_5 {dimension_numbers = #tpu.dot_dimension_numbers<[1], [0], [0], [1], [0, 0, 1, 1], [], []>} : vector<32x32xf32>, vector<32x256xf32>, vector<32x256xf32> -> vector<32x256xf32>
    %19 = vector.broadcast %4 : vector<32x1xf32> to vector<32x256xf32>
    %20 = arith.addf %18, %19 : vector<32x256xf32>
    %cst_6 = arith.constant 0.000000e+00 : f32
    %21 = vector.broadcast %cst_6 : f32 to vector<32x256xf32>
    %22 = arith.maximumf %20, %21 : vector<32x256xf32>
    %23 = vector.broadcast %5 : vector<32x1xf32> to vector<32x256xf32>
    %24 = arith.mulf %23, %22 : vector<32x256xf32>
    %cst_7 = arith.constant dense<0.000000e+00> : vector<256xf32>
    %25 = vector.multi_reduction <add>, %24, %cst_7 [0] : vector<32x256xf32> to vector<256xf32>
    %26 = vector.shape_cast %25 : vector<256xf32> to vector<1x256xf32>
    %27 = vector.broadcast %6 : vector<1x1xf32> to vector<1x256xf32>
    %28 = arith.addf %26, %27 : vector<1x256xf32>
    %c0_8 = arith.constant 0 : index
    %c0_9 = arith.constant 0 : index
    %29 = vector.load %arg3[%c0_8, %c0_9] : memref<1x256xf32, #tpu.memory_space<vmem>>, vector<1x256xf32>
    tpu.vector_store %arg3[%c0_8, %c0_9], %28 {strides = array<i32>} : memref<1x256xf32, #tpu.memory_space<vmem>>, vector<1x256xf32>,
    return
  }
}

</mosaic_0001>

<bundles_post_ra>
// kernel: net_forward.1
= control target key start
LH: loop header
LB: loop body
LE: loop exit
PB: predicated region body
PF: predicated region fallthrough
CT: control target
= control target key end

     0   :  { %v409_v0 = vmov 1   ;;  %v410_v1 = vmov 0   ;;  %v411_v6 = vmov 0.0   ;;  %v412_v7 = vmov 2   ;;  %s477_s1 = inlined_call_operand.vmem [shape: f32[32,8], index: 1, kind: input, shape index: {}]   ;;  %s478_s0 = inlined_call_operand.vmem [shape: f32[1,256], index: 0, kind: input, shape index: {}]   ;;  %s479_s2 = inlined_call_operand.vmem [shape: f32[32,32], index: 2, kind: input, shape index: {}]   ;;  %s480_s3 = inlined_call_operand.vmem [shape: f32[1,256], index: 3, kind: output, shape index: {}]  }
   0x1   :  { %367 = vset.pattern.permute.xlu1 %v409_v0  ;;  %366 = vset.pattern.permute.xlu0 %v410_v1  ;;  %v15_v2 = vld [vmem:[%s477_s1] sm:$0xff]  ;;  %v16_v3 = vld [vmem:[%s477_s1 + $0x8] sm:$0xff]  ;;  %v17_v4 = vld [vmem:[%s477_s1 + $0x10] sm:$0xff]  ;;  %v413_v8 = vmov 3   ;;  %v414_v9 = vmov 4   ;;  %v40_v10 = vlaneseq  ;;  %vm150_vm0 = vcmask 261120  }
   0x2   :  { %59 = vperm.xlu1 %367, %v15_v2   ;;  %21 = vperm.xlu0 %366, %v15_v2   ;;  %v18_v5 = vld [vmem:[%s477_s1 + $0x18] sm:$0xff]  ;;  %v14_v14 = vld [vmem:[%s478_s0] sm:$0x3] }
   0x3   :  { %227 = vmatprep.mubr.f32.mxu0 %v411_v6  ;;  %239 = vmatprep.mubr.f32.mxu1 %v411_v6  ;;  %v451_v11 = vshrl.u32 %v40_v10, 7  ;;  %vm328_vm1 = vcmp.lt.s32.totalorder %v40_v10, 256 }
   0x5   :  { %v42_v12 = vsub.s32 0, %v451_v11  ;;  %v46_v13 = vsub.s32 1, %v451_v11 }
   0x6   :  { %63 = vperm.xlu1 %367, %v16_v3   ;;  %26 = vperm.xlu0 %366, %v16_v3  }
   0x7   :  { %v43_v15 = vrot.slane %v14_v14, %v42_v12  ;;  %v47_v16 = vrot.slane %v14_v14, %v46_v13 }
   0xa   :  { %368 = vset.pattern.permute.xlu1 %v410_v1  ;;  %31 = vperm.xlu0 %366, %v17_v4  }
   0xb   :  { %36 = vperm.xlu1 %368, %v18_v5  }
   0xe   :  { %369 = vset.pattern.permute.xlu0 %v409_v0 }
   0xf   :  { %370 = vset.pattern.permute.xlu1 %v409_v0  ;;  %67 = vperm.xlu0 %369, %v17_v4  }
  0x10   :  { %71 = vperm.xlu1 %370, %v18_v5  }
  0x13   :  { %372 = vset.pattern.permute.xlu0 %v412_v7 }
  0x14   :  { %371 = vset.pattern.permute.xlu1 %v412_v7  ;;  %139 = vperm.xlu0 %372, %v16_v3  }
  0x15   :  { %135 = vperm.xlu1 %371, %v15_v2  }
  0x18   :  { %373 = vset.pattern.permute.xlu0 %v413_v8 }
  0x19   :  { %143 = vperm.xlu1 %371, %v17_v4   ;;  %261 = vperm.xlu0 %373, %v15_v2  }
  0x1d   :  { %147 = vperm.xlu1 %371, %v18_v5   ;;  %273 = vperm.xlu0 %373, %v18_v5  }
  0x21   :  { %374 = vset.pattern.permute.xlu1 %v413_v8  ;;  %376 = vset.pattern.permute.xlu0 %v414_v9 }
  0x22   :  { %265 = vperm.xlu1 %374, %v16_v3  }
  0x26   :  { %269 = vperm.xlu1 %374, %v17_v4  }
  0x2a   :  { %375 = vset.pattern.permute.xlu1 %v414_v9 }
  0x2b   :  { %303 = vperm.xlu1 %375, %v15_v2  }
  0x81   :  { %v60_v17 = vpop.permute.xlu1 %59  ;;  %v22_v18 = vpop.permute.xlu0 %21 }
  0x82   :  { %v50_v19 = vmul.f32 %v43_v15, %v22_v18  ;;  %v51_v20 = vmul.f32 %v47_v16, %v22_v18  ;;  %v131_v18 = vld [vmem:[%s479_s2 + $0x8] sm:$0xff] }
  0x84   :  { %v74_v21 = vadd.f32 %v60_v17, %v50_v19  ;;  %v75_v22 = vadd.f32 %v60_v17, %v51_v20  ;;  %v132_v17 = vld [vmem:[%s479_s2 + $0x10] sm:$0xff]  ;;  %v133_v19 = vld [vmem:[%s479_s2 + $0x18] sm:$0xff] }
  0x85   :  { %v64_v23 = vpop.permute.xlu1 %63  ;;  %v27_v24 = vpop.permute.xlu0 %26 }
  0x86   :  { %v335_v25 = vmul.f32 -1.442695, %v74_v21  ;;  %v336_v26 = vmul.f32 -1.442695, %v75_v22  ;;  %v52_v27 = vmul.f32 %v43_v15, %v27_v24  ;;  %v53_v28 = vmul.f32 %v47_v16, %v27_v24 }
  0x88   :  { %377 = vpow2.f32 %v335_v25  ;;  %v76_v29 = vadd.f32 %v64_v23, %v52_v27  ;;  %v77_v30 = vadd.f32 %v64_v23, %v53_v28 }
  0x89   :  { %379 = vpow2.f32 %v336_v26  ;;  %v32_v31 = vpop.permute.xlu0 %31 }
  0x8a   :  { %v337_v32 = vmul.f32 -1.442695, %v76_v29  ;;  %v338_v33 = vmul.f32 -1.442695, %v77_v30  ;;  %v37_v34 = vpop.permute.xlu1 %36  ;;  %v54_v35 = vmul.f32 %v43_v15, %v32_v31  ;;  %v55_v36 = vmul.f32 %v47_v16, %v32_v31 }
  0x8b   :  { %v56_v37 = vmul.f32 %v43_v15, %v37_v34  ;;  %v57_v38 = vmul.f32 %v47_v16, %v37_v34  ;;  %v130_v16 = vld [vmem:[%s479_s2] sm:$0xff] }
  0x8c   :  { %381 = vpow2.f32 %v337_v32 }
  0x8d   :  { %383 = vpow2.f32 %v338_v33 }
  0x8e   :  { %v68_v39 = vpop.permute.xlu0 %67 }
  0x8f   :  { %v78_v40 = vadd.f32 %v68_v39, %v54_v35  ;;  %v79_v41 = vadd.f32 %v68_v39, %v55_v36  ;;  %v72_v42 = vpop.permute.xlu1 %71 }
  0x90   :  { %v80_v43 = vadd.f32 %v72_v42, %v56_v37  ;;  %v81_v44 = vadd.f32 %v72_v42, %v57_v38 }
  0x91   :  { %v339_v45 = vmul.f32 -1.442695, %v78_v40  ;;  %v340_v46 = vmul.f32 -1.442695, %v79_v41 }
  0x92   :  { %v378_v47 = vpop.eup %377  ;;  %v341_v50 = vmul.f32 -1.442695, %v80_v43  ;;  %v342_v52 = vmul.f32 -1.442695, %v81_v44 }
  0x93   :  { %v380_v48 = vpop.eup %379  ;;  %v106_v49 = vadd.f32 1.0, %v378_v47  ;;  %385 = vpow2.f32 %v339_v45  ;;  %v140_v22 = vpop.permute.xlu0 %139 }
  0x94   :  { %v107_v51 = vadd.f32 1.0, %v380_v48  ;;  %387 = vpow2.f32 %v340_v46  ;;  %v136_v20 = vpop.permute.xlu1 %135 }
  0x95   :  { %389 = vrcp.f32 %v106_v49 }
  0x96   :  { %v382_v53 = vpop.eup %381  ;;  %391 = vrcp.f32 %v107_v51 }
  0x97   :  { %v384_v54 = vpop.eup %383  ;;  %v108_v55 = vadd.f32 1.0, %v382_v53  ;;  %393 = vpow2.f32 %v341_v50 }
  0x98   :  { %v109_v56 = vadd.f32 1.0, %v384_v54  ;;  %395 = vpow2.f32 %v342_v52  ;;  %v144_v21 = vpop.permute.xlu1 %143  ;;  %v262_v31 = vpop.permute.xlu0 %261 }
  0x99   :  { %397 = vrcp.f32 %v108_v55 }
  0x9a   :  { %399 = vrcp.f32 %v109_v56 }
  0x9c   :  { %v148_v23 = vpop.permute.xlu1 %147  ;;  %v274_v54 = vpop.permute.xlu0 %273 }
  0x9d   :  { %v386_v57 = vpop.eup %385 }
  0x9e   :  { %v388_v58 = vpop.eup %387  ;;  %v110_v59 = vadd.f32 1.0, %v386_v57 }
  0x9f   :  { %v390_v60 = vpop.eup %389  ;;  %v111_v61 = vadd.f32 1.0, %v388_v58 }
  0xa0   :  { %v392_v62 = vpop.eup %391  ;;  %401 = vrcp.f32 %v110_v59 }
  0xa1   :  { %v394_v63 = vpop.eup %393  ;;  %403 = vrcp.f32 %v111_v61 }
  0xa2   :  { %v396_v0 = vpop.eup %395  ;;  %v112_v1 = vadd.f32 1.0, %v394_v63 }
  0xa3   :  { %v398_v2 = vpop.eup %397  ;;  %v113_v3 = vadd.f32 1.0, %v396_v0 }
  0xa4   :  { %v400_v4 = vpop.eup %399  ;;  %405 = vrcp.f32 %v112_v1  ;;  %v349_v5 = vpack.c.bf16 %v398_v2, %v390_v60 }
  0xa5   :  { %407 = vrcp.f32 %v113_v3  ;;  %v347_v7 = vpack.c.bf16 %v400_v4, %v392_v62 }
  0xa7   :  { %348 = vmatprep.subr.bf16.mxu0 %v347_v7  ;;  %355 = vmatprep.subr.bf16.mxu1 %v347_v7  ;;  %v415_v7 = vmov 1966171168  }
  0xa8   :  { %350 = vmatpush1.bf16.msra.mxu0 %v349_v5  ;;  %357 = vmatpush1.bf16.msra.mxu1 %v349_v5 }
  0xaa   :  { %v402_v8 = vpop.eup %401 }
  0xab   :  { %v404_v9 = vpop.eup %403 }
  0xae   :  { %v406_v12 = vpop.eup %405 }
  0xaf   :  { %v408_v13 = vpop.eup %407  ;;  %v353_v14 = vpack.c.bf16 %v406_v12, %v402_v8  ;;  %v312_v8 = vunpack.c.l.s4 %v415_v7 }
  0xb0   :  { %v351_v15 = vpack.c.bf16 %v408_v13, %v404_v9 }
  0xb2   :  { %352 = vmatprep.subr.bf16.mxu0 %v351_v15  ;;  %356 = vmatprep.subr.bf16.mxu1 %v351_v15  ;;  %v313_v15 = vunpack.c.0.s8 %v312_v8 }
  0xb3   :  { %354 = vmatpush1.bf16.msra.mxu0 %v353_v14  ;;  %358 = vmatpush1.bf16.msra.mxu1 %v353_v14 }
  0xb6   :  { %343 = vmatmul.mubr.msk.f32.vlgmr.msra.gmra.mrb[0].mxu0 %vm150_vm0, %v130_v16  ;;  %345 = vmatmul.mubr.msk.f32.vlgmr.msra.gmra.mrb[0].mxu1 %vm150_vm0, %v132_v17 }
  0xb7   :  { %233 = vmatprep.mubr.f32.mxu0 %v411_v6  ;;  %245 = vmatprep.mubr.f32.mxu1 %v411_v6  ;;  %v266_v6 = vpop.permute.xlu1 %265 }
  0xba   :  { %344 = vmatmul.mubr.msk.f32.gmra.mrb[2].mxu0 %vm150_vm0, %v131_v18  ;;  %346 = vmatmul.mubr.msk.f32.gmra.mrb[2].mxu1 %vm150_vm0, %v133_v19 }
  0xbb   :  { %v270_v46 = vpop.permute.xlu1 %269 }
  0xbf   :  { %v304_v16 = vpop.permute.xlu1 %303 }
 0x189   :  { %v229_v24 = vpop.f32.mrb[0].mxu0  ;;  %v241_v25 = vpop.f32.mrb[0].mxu1 }
 0x18a   :  { %v230_v26 = vadd.f32 %v229_v24, %v136_v20  ;;  %v231_v27 = vpop.f32.mrb[1].mxu0  ;;  %v243_v28 = vpop.f32.mrb[1].mxu1  ;;  %v242_v30 = vadd.f32 %v241_v25, %v144_v21 }
 0x18b   :  { %v232_v29 = vadd.f32 %v231_v27, %v136_v20  ;;  %v244_v32 = vadd.f32 %v243_v28, %v144_v21  ;;  %v316_v21 = vsub.s32 %v313_v15, %v451_v11 }
 0x18c   :  { %v252_v35 = vmax.f32 %v230_v26, 0.0  ;;  %v256_v43 = vmax.f32 %v242_v30, 0.0 }
 0x18d   :  { %v235_v33 = vpop.f32.mrb[2].mxu0  ;;  %v247_v34 = vpop.f32.mrb[2].mxu1  ;;  %v253_v40 = vmax.f32 %v232_v29, 0.0  ;;  %v257_v45 = vmax.f32 %v244_v32, 0.0 }
 0x18e   :  { %v236_v36 = vadd.f32 %v235_v33, %v140_v22  ;;  %v248_v37 = vadd.f32 %v247_v34, %v148_v23  ;;  %v237_v38 = vpop.f32.mrb[3].mxu0  ;;  %v249_v39 = vpop.f32.mrb[3].mxu1  ;;  %v276_v48 = vmul.f32 %v262_v31, %v252_v35  ;;  %v280_v55 = vmul.f32 %v270_v46, %v256_v43 }
 0x18f   :  { %v238_v41 = vadd.f32 %v237_v38, %v140_v22  ;;  %v250_v42 = vadd.f32 %v249_v39, %v148_v23  ;;  %v277_v51 = vmul.f32 %v262_v31, %v253_v40  ;;  %v281_v57 = vmul.f32 %v270_v46, %v257_v45 }
 0x190   :  { %v254_v44 = vmax.f32 %v236_v36, 0.0  ;;  %v258_v50 = vmax.f32 %v248_v37, 0.0 }
 0x191   :  { %v255_v47 = vmax.f32 %v238_v41, 0.0  ;;  %v259_v53 = vmax.f32 %v250_v42, 0.0 }
 0x192   :  { %v278_v49 = vmul.f32 %v266_v6, %v254_v44  ;;  %v282_v59 = vmul.f32 %v274_v54, %v258_v50 }
 0x193   :  { %v279_v52 = vmul.f32 %v266_v6, %v255_v47  ;;  %v283_v61 = vmul.f32 %v274_v54, %v259_v53 }
 0x194   :  { %v284_v56 = vadd.f32 %v278_v49, %v276_v48 }
 0x195   :  { %v293_v58 = vadd.f32 %v279_v52, %v277_v51 }
 0x196   :  { %v285_v60 = vadd.f32 %v284_v56, %v280_v55 }
 0x197   :  { %v294_v62 = vadd.f32 %v293_v58, %v281_v57 }
 0x198   :  { %v286_v63 = vadd.f32 %v285_v60, %v282_v59 }
 0x199   :  { %v295_v0 = vadd.f32 %v294_v62, %v283_v61 }
 0x19a   :  { %v287_v1 = vrot.slane %v286_v63, 4 }
 0x19b   :  { %v296_v2 = vrot.slane %v295_v0, 4 }
 0x19c   :  { %v288_v3 = vadd.f32 %v287_v1, %v286_v63 }
 0x19d   :  { %v297_v4 = vadd.f32 %v296_v2, %v295_v0 }
 0x19e   :  { %v289_v5 = vrot.slane %v288_v3, 2 }
 0x19f   :  { %v298_v9 = vrot.slane %v297_v4, 2 }
 0x1a0   :  { %v290_v12 = vadd.f32 %v289_v5, %v288_v3 }
 0x1a1   :  { %v299_v13 = vadd.f32 %v298_v9, %v297_v4 }
 0x1a2   :  { %v291_v14 = vrot.slane %v290_v12, 1 }
 0x1a3   :  { %v300_v17 = vrot.slane %v299_v13, 1 }
 0x1a4   :  { %v292_v18 = vadd.f32 %v291_v14, %v290_v12 }
 0x1a5   :  { %v301_v19 = vadd.f32 %v300_v17, %v299_v13 }
 0x1a6   :  { %v306_v20 = vadd.f32 %v304_v16, %v292_v18 }
 0x1a7   :  { %v307_v22 = vadd.f32 %v304_v16, %v301_v19 }
 0x1a9   :  { %v310_v23 = vcombine.low %v306_v20, %v307_v22 }
 0x1ab   :  { %v317_v24 = vrot.slane %v310_v23, %v316_v21 }
 0x1ad   :  { %v324_v25 = vrot.slane %v317_v24, %v316_v21 }
 0x1af   :  { %330 = vst.msk [vmem:[%s480_s3] sm:$0x3] %vm328_vm1, %v324_v25 }

</bundles_post_ra>
